<compile_context>
chip_gen: v7x
topology: tpu7x:2x2x1
jax: 0.10.0
libtpu: 0.0.40
codegen_flags: <defaults>
</compile_context>

<pallas_src>
import functools

import jax
import jax.numpy as jnp
from jax.experimental import pallas as pl
from jax.experimental.pallas import tpu as pltpu

_SENTINEL = 2.0        # softmax probs are <= 1.0; marks ignored pixels
_MAX_TILE_P = 32768    # hard cap on pixels per grid step (lane axis)
_HIST_BINS = 64        # bin 0 = pred <= thresh; bins 1..B-1 uniform over (thresh, 1]


def _round_up(x, m):
    return (x + m - 1) // m * m


@functools.lru_cache(maxsize=None)
def _vmem_capacity_bytes():
    try:
        return int(getattr(pltpu.get_tpu_info(), "vmem_capacity_bytes", 64 << 20))
    except Exception:
        return 64 << 20          # conservative fallback (v7x-sized)


def _tile_budget_bytes():
    # Working budget used to size tiles: v5e/v6e have 128 MiB VMEM, v7x only
    # 64 MiB; leave ample headroom for Mosaic scratch / double-buffering slop.
    return max(8 << 20, min(_vmem_capacity_bytes() // 4, 24 << 20))


def _vmem_limit_bytes():
    # Explicit scoped-VMEM limit (v5e defaults to only 16 MiB).
    return max(32 << 20, min(_vmem_capacity_bytes() // 2, 64 << 20))


def _fit_lane_tile(t, hw):
    """Clamp a lane tile to a multiple of 128 so the last grid block is at most
    a partially-masked boundary block (no host-side padding of the inputs)."""
    t = max(128, (t // 128) * 128)
    hw_floor = (hw // 128) * 128
    if hw_floor >= 128:
        t = min(t, hw_floor)
    return t


def _logits_pass_tile(C, hw, num_bins=0):
    # per-lane VMEM bytes ~ double-buffered (1,C,T) logits block + ~4 f32 (C,T)
    # intermediates + (num_bins,T) histogram accumulator/one-hot + small rows.
    per_lane = 4 * (6 * C + 3 * num_bins + 24)
    return _fit_lane_tile(min(_tile_budget_bytes() // per_lane, _MAX_TILE_P), hw)


def _reduce_pass_tile(hw):
    per_lane = 4 * 24            # pred/loss in + two accumulators, double-buffered
    return _fit_lane_tile(min(_tile_budget_bytes() // per_lane, _MAX_TILE_P), hw)


# --------------------------- shared per-tile math ---------------------------
def _target_ce(ignore_label, hw, x_ref, t_ref):
    """Classes on sublanes, pixels on lanes.

    Returns (ok, loss) where `ok` masks in-bounds, non-ignored pixels and
    loss = logsumexp(x) - x[target]   (garbage where ~ok; always apply `ok`
    with jnp.where — never arithmetic masking — so NaN/Inf cannot leak)."""
    tile = x_ref.shape[-1]
    x = x_ref[0].astype(jnp.float32)                        # (C, T)
    tgt = t_ref[0]                                          # (1, T) int32
    pix = pl.program_id(1) * tile + jax.lax.broadcasted_iota(jnp.int32, (1, tile), 1)
    ok = (tgt != ignore_label) & (pix < hw)                 # (1, T)

    m = jnp.max(x, axis=0, keepdims=True)                   # (1, T)
    e = jnp.exp(x - m)                                      # (C, T)
    lse = m + jnp.log(jnp.sum(e, axis=0, keepdims=True))    # (1, T)
    classes = jax.lax.broadcasted_iota(jnp.int32, x.shape, 0)
    tmp_t = jnp.where(ok, tgt, 0)                           # ignore/pad -> class 0
    tgt_logit = jnp.sum(jnp.where(classes == tmp_t, x, 0.0),
                        axis=0, keepdims=True)              # (1, T)
    return ok, lse - tgt_logit


# ------------- kernel 1: fused CE + partial-sum reduction (CE branches) -------------
def _ce_sum_kernel(ignore_label, hw, x_ref, t_ref, losssum_ref):
    @pl.when(pl.program_id(1) == 0)
    def _():
        losssum_ref[...] = jnp.zeros_like(losssum_ref)

    ok, loss = _target_ce(ignore_label, hw, x_ref, t_ref)
    loss = jnp.where(ok, loss, 0.0)          # CE = 0 at ignore_index / OOB tail
    losssum_ref[...] += loss.reshape(losssum_ref.shape)


# ------------- kernel 2: OHEM pass 1 — CE loss, target prob, histogram -------------
def _ohem_pred_kernel(ignore_label, thresh, hw, num_bins,
                      x_ref, t_ref, pred_ref, loss_ref, hist_ref):
    @pl.when(pl.program_id(1) == 0)
    def _():
        hist_ref[...] = jnp.zeros_like(hist_ref)

    tile = x_ref.shape[-1]
    ok, loss = _target_ce(ignore_label, hw, x_ref, t_ref)
    pred = jnp.exp(-loss)                    # softmax prob of target class (EUP)

    pred_ref[...] = jnp.where(ok, pred, _SENTINEL).reshape(pred_ref.shape)
    loss_ref[...] = jnp.where(ok, loss, 0.0).reshape(loss_ref.shape)

    # Histogram partials for the order statistic.  bin 0 counts pred <= thresh
    # *exactly*; bins 1..B-1 split (thresh, 1] uniformly.
    scale = (num_bins - 1) / max(1.0 - thresh, 1e-6)         # static python float
    binf = jnp.ceil((pred - jnp.float32(thresh)) * jnp.float32(scale))
    bin_idx = jnp.clip(binf, 0.0, float(num_bins - 1)).astype(jnp.int32)
    bin_idx = jnp.where(ok, bin_idx, -1)     # drop ignored / OOB-tail pixels
    bins = jax.lax.broadcasted_iota(jnp.int32, (num_bins, tile), 0)
    hist_ref[...] += (bins == bin_idx).astype(jnp.float32).reshape(hist_ref.shape)


# ------------- kernel 3: OHEM pass 2 — thresholded partial reduction -------------
def _ohem_reduce_kernel(hw, thr_ref, pred_ref, loss_ref, keeploss_ref, nkeep_ref):
    # thr_ref: SMEM scalar-prefetch (1,) f32; pred/loss: (1, 1, T);
    # outputs: lane-dense (1, 1, T) partials, resident across the pixel-tile axis.
    @pl.when(pl.program_id(1) == 0)
    def _():
        keeploss_ref[...] = jnp.zeros_like(keeploss_ref)
        nkeep_ref[...] = jnp.zeros_like(nkeep_ref)

    tile = pred_ref.shape[-1]
    pix = pl.program_id(1) * tile + jax.lax.broadcasted_iota(jnp.int32, (1, 1, tile), 2)
    keep = (pix < hw) & (pred_ref[...] < thr_ref[0])   # sentinel 2.0 always fails
    keeploss_ref[...] += jnp.where(keep, loss_ref[...], 0.0)
    nkeep_ref[...] += keep.astype(jnp.float32)


# ----------------------------- pallas_call wrappers -----------------------------
def _ce_branch_sum(x, t, ignore_label, hw, tile):
    N, C, _ = x.shape
    grid = (N, pl.cdiv(hw, tile))
    # TODO(synk): for v7x with N == 1, add a leading size-2 "parallel" grid axis
    # splitting the pixel tiles (one partial-accumulator row per TensorCore).
    kernel = functools.partial(_ce_sum_kernel, ignore_label, hw)
    return pl.pallas_call(
        kernel,
        out_shape=jax.ShapeDtypeStruct((N, 1, tile), jnp.float32),
        grid_spec=pltpu.PrefetchScalarGridSpec(
            num_scalar_prefetch=0,
            grid=grid,
            in_specs=[pl.BlockSpec((1, C, tile), lambda n, i: (n, 0, i)),
                      pl.BlockSpec((1, 1, tile), lambda n, i: (n, 0, i))],
            out_specs=pl.BlockSpec((1, 1, tile), lambda n, i: (n, 0, 0)),
        ),
        compiler_params=pltpu.CompilerParams(
            dimension_semantics=("parallel", "arbitrary"),
            vmem_limit_bytes=_vmem_limit_bytes()),
    )(x, t)


def _ohem_pred(x, t, ignore_label, thresh, hw, tile, num_bins):
    N, C, HW = x.shape
    grid = (N, pl.cdiv(hw, tile))
    kernel = functools.partial(_ohem_pred_kernel, ignore_label, thresh, hw, num_bins)
    return pl.pallas_call(
        kernel,
        out_shape=(jax.ShapeDtypeStruct((N, 1, HW), jnp.float32),    # pred
                   jax.ShapeDtypeStruct((N, 1, HW), jnp.float32),    # exact CE loss
                   jax.ShapeDtypeStruct((N, num_bins, tile), jnp.float32)),  # hist
        grid_spec=pltpu.PrefetchScalarGridSpec(
            num_scalar_prefetch=0,
            grid=grid,
            in_specs=[pl.BlockSpec((1, C, tile), lambda n, i: (n, 0, i)),
                      pl.BlockSpec((1, 1, tile), lambda n, i: (n, 0, i))],
            out_specs=[pl.BlockSpec((1, 1, tile), lambda n, i: (n, 0, i)),
                       pl.BlockSpec((1, 1, tile), lambda n, i: (n, 0, i)),
                       pl.BlockSpec((1, num_bins, tile), lambda n, i: (n, 0, 0))],
        ),
        compiler_params=pltpu.CompilerParams(
            dimension_semantics=("parallel", "arbitrary"),
            vmem_limit_bytes=_vmem_limit_bytes()),
    )(x, t)


def _ohem_reduce(thr, pred, loss, hw, tile):
    N, _, HW = pred.shape
    grid = (N, pl.cdiv(hw, tile))
    kernel = functools.partial(_ohem_reduce_kernel, hw)
    return pl.pallas_call(
        kernel,
        out_shape=(jax.ShapeDtypeStruct((N, 1, tile), jnp.float32),
                   jax.ShapeDtypeStruct((N, 1, tile), jnp.float32)),
        grid_spec=pltpu.PrefetchScalarGridSpec(
            num_scalar_prefetch=1,          # threshold lives in SMEM
            grid=grid,
            in_specs=[pl.BlockSpec((1, 1, tile), lambda n, i, thr_ref: (n, 0, i)),
                      pl.BlockSpec((1, 1, tile), lambda n, i, thr_ref: (n, 0, i))],
            out_specs=[pl.BlockSpec((1, 1, tile), lambda n, i, thr_ref: (n, 0, 0)),
                       pl.BlockSpec((1, 1, tile), lambda n, i, thr_ref: (n, 0, 0))],
        ),
        compiler_params=pltpu.CompilerParams(
            dimension_semantics=("parallel", "arbitrary"),
            vmem_limit_bytes=_vmem_limit_bytes()),
    )(thr, pred, loss)


# --------------------------------- module port ---------------------------------
class OhemCrossEntropy:
    """JAX/Pallas port of the PyTorch OhemCrossEntropy module (weight=None)."""

    def __init__(self, num_classes, ignore_label=-1, thres=0.7, min_kept=100000,
                 weight=None):
        assert weight is None, "per-class weight is not supported"
        self.num_classes = num_classes
        self.thresh = float(thres)
        self.min_kept = max(1, min_kept)
        self.ignore_label = ignore_label

    def _prep(self, score, target):
        N, C, H, W = score.shape
        h, w = target.shape[1], target.shape[2]
        # TODO(synk): F.interpolate bilinear resize branch (ph != h) not implemented.
        assert (H, W) == (h, w), "score/target spatial sizes must match"
        HW = H * W
        x = score.reshape(N, C, HW)                 # contiguous: no transpose, no pad
        t = target.reshape(N, 1, HW).astype(jnp.int32)
        return x, t, HW

    def _ce_forward(self, score, target):
        x, t, HW = self._prep(score, target)
        N, C = x.shape[0], x.shape[1]
        tile = _logits_pass_tile(C, HW)
        # torch: reduction='none' map, later averaged over ALL pixels (ignored -> 0)
        part = _ce_branch_sum(x, t, self.ignore_label, HW, tile)
        return jnp.sum(part) / jnp.float32(N * HW)

    def _ohem_forward(self, score, target):
        x, t, HW = self._prep(score, target)
        N, C = x.shape[0], x.shape[1]
        tile2 = _logits_pass_tile(C, HW, _HIST_BINS)
        pred, loss, hist_part = _ohem_pred(x, t, self.ignore_label, self.thresh,
                                           HW, tile2, _HIST_BINS)

        # Order statistic without a full sort / top_k.  Counts are cast to int32
        # before summing so they stay exact for >2^24 pixels.  Exact short-circuit
        # to `thresh` when >= k+1 valid preds are <= thresh (the common case);
        # otherwise the k-th smallest pred is approximated by the upper edge of
        # its histogram bin over (thresh, 1]  (resolution (1-thresh)/(B-1)).
        hist = jnp.sum(hist_part.astype(jnp.int32), axis=(0, 2))      # (B,) exact
        n_valid = jnp.sum(hist)
        k = jnp.minimum(jnp.int32(self.min_kept), n_valid - 1)
        cum = jnp.cumsum(hist)
        bstar = jnp.argmax(cum >= k + 1).astype(jnp.float32)   # 0 -> threshold == thresh
        bin_w = max(1.0 - self.thresh, 1e-6) / (_HIST_BINS - 1)
        threshold = jnp.float32(self.thresh) + bstar * jnp.float32(bin_w)

        tile3 = _reduce_pass_tile(HW)
        keeploss_part, nkeep_part = _ohem_reduce(
            threshold.reshape(1), pred, loss, HW, tile3)
        n_keep = jnp.sum(nkeep_part.astype(jnp.int32))
        # NOTE: if every pixel is ignored, n_keep == 0 and this returns NaN
        # (the torch reference raises an error instead).
        return jnp.sum(keeploss_part) / n_keep.astype(jnp.float32)

    def __call__(self, score, target):
        if self.num_classes == 1:
            score = [score]
        weights = [1.0] * self.num_classes
        n = min(len(weights), len(score))  # zip truncation semantics
        total = jnp.float32(0.0)
        for i in range(n):
            if i == self.num_classes - 1:
                total = total + weights[i] * self._ohem_forward(score[i], target)
            else:
                total = total + weights[i] * self._ce_forward(score[i], target)
        # torch: sum of per-pixel CE maps + broadcast ohem scalar, unsqueeze, .mean()
        #        == sum of per-branch means; returned here as a scalar.
        return total


# ------------------------------ pure-jnp reference ------------------------------
def _ref_forward(module, scores, target):
    ign = module.ignore_label

    def ce_map(score, target):
        logp = jax.nn.log_softmax(score, axis=1)
        t = jnp.where(target == ign, 0, target)
        picked = jnp.take_along_axis(logp, t[:, None, :, :], axis=1)[:, 0]
        return jnp.where(target == ign, 0.0, -picked)

    def ohem(score, target):
        loss = ce_map(score, target).reshape(-1)
        p = jax.nn.softmax(score, axis=1)
        t = jnp.where(target == ign, 0, target)
        pred = jnp.take_along_axis(p, t[:, None, :, :], axis=1)[:, 0].reshape(-1)
        mask = (target != ign).reshape(-1)
        n_valid = jnp.sum(mask)
        sorted_pred = jnp.sort(jnp.where(mask, pred, jnp.inf))
        k = jnp.minimum(module.min_kept, n_valid - 1)
        threshold = jnp.maximum(sorted_pred[k], module.thresh)
        keep = mask & (pred < threshold)
        return jnp.sum(jnp.where(keep, loss, 0.0)) / jnp.sum(keep)

    if module.num_classes == 1:
        scores = [scores]
    n = min(module.num_classes, len(scores))
    total = jnp.float32(0.0)
    for i in range(n):
        if i == module.num_classes - 1:
            total = total + ohem(scores[i], target)
        else:
            total = total + jnp.mean(ce_map(scores[i], target))
    return total


if __name__ == "__main__":
    key = jax.random.PRNGKey(0)
    num_classes = 4
    mod = OhemCrossEntropy(num_classes=num_classes, ignore_label=-1,
                           thres=0.7, min_kept=64)

    def make_inputs(key, N, H, W):
        k_s, k_t, k_m = jax.random.split(key, 3)
        scores = [2.0 * jax.random.normal(jax.random.fold_in(k_s, i),
                                          (N, num_classes, H, W), jnp.float32)
                  for i in range(num_classes)]
        target = jax.random.randint(k_t, (N, H, W), 0, num_classes, dtype=jnp.int32)
        ignore = jax.random.uniform(k_m, (N, H, W)) < 0.1
        return scores, jnp.where(ignore, -1, target)

    # One aligned spatial size (H*W multiple of 128) and one ragged size that
    # exercises the in-kernel tail masking (no host-side padding of the logits).
    for (N, H, W) in [(2, 16, 16), (2, 16, 20)]:
        scores, target = make_inputs(jax.random.fold_in(key, H * W), N, H, W)
        out = jax.block_until_ready(mod(scores, target))
        ref = _ref_forward(mod, scores, target)
        assert jnp.isfinite(out), (out, (N, H, W))
        assert jnp.allclose(out, ref, rtol=2e-3, atol=2e-3), (out, ref, (N, H, W))
    print("KERNEL_OK")
</pallas_src>

<mosaic_0001>
module attributes {stable_mosaic.version = 11 : i64} {
  func.func @_ce_sum_kernel(%arg0: i32, %arg1: i32, %arg2: memref<1x4x256xf32, #tpu.memory_space<vmem>>, %arg3: memref<1x1x256xi32, #tpu.memory_space<vmem>>, %arg4: memref<1x1x256xf32, #tpu.memory_space<vmem>>) attributes {dimension_semantics = [#tpu.dimension_semantics<parallel>, #tpu.dimension_semantics<arbitrary>], iteration_bounds = array<i64: 2, 1>, scalar_prefetch = 0 : i64, scratch_operands = 0 : i64, tpu.core_type = #tpu.core_type<tc>, window_params = [{transform_indices = @transform_0, window_bounds = array<i64: 1, 4, 256>}, {transform_indices = @transform_1, window_bounds = array<i64: 1, 1, 256>}, {transform_indices = @transform_2, window_bounds = array<i64: 1, 1, 256>}]} {
    %c0_i32 = arith.constant 0 : i32
    %0 = arith.cmpi eq, %arg1, %c0_i32 : i32
    %1 = arith.extui %0 : i1 to i32
    %c0_i32_0 = arith.constant 0 : i32
    %2 = arith.cmpi ne, %1, %c0_i32_0 : i32
    scf.if %2 {
      %cst_18 = arith.constant 0.000000e+00 : f32
      %41 = vector.broadcast %cst_18 : f32 to vector<1x1x256xf32>
      %c0_19 = arith.constant 0 : index
      %c0_20 = arith.constant 0 : index
      %c0_21 = arith.constant 0 : index
      %42 = vector.load %arg4[%c0_19, %c0_20, %c0_21] : memref<1x1x256xf32, #tpu.memory_space<vmem>>, vector<1x1x256xf32>
      tpu.vector_store %arg4[%c0_19, %c0_20, %c0_21], %41 {strides = array<i32>} : memref<1x1x256xf32, #tpu.memory_space<vmem>>, vector<1x1x256xf32>,
    } else {
    }
    %c0 = arith.constant 0 : index
    %c0_1 = arith.constant 0 : index
    %c0_2 = arith.constant 0 : index
    %3 = vector.load %arg2[%c0, %c0_1, %c0_2] : memref<1x4x256xf32, #tpu.memory_space<vmem>>, vector<1x4x256xf32>
    %4 = vector.shape_cast %3 : vector<1x4x256xf32> to vector<4x256xf32>
    %c0_3 = arith.constant 0 : index
    %c0_4 = arith.constant 0 : index
    %c0_5 = arith.constant 0 : index
    %5 = vector.load %arg3[%c0_3, %c0_4, %c0_5] : memref<1x1x256xi32, #tpu.memory_space<vmem>>, vector<1x1x256xi32>
    %6 = vector.shape_cast %5 : vector<1x1x256xi32> to vector<1x256xi32>
    %c256_i32 = arith.constant 256 : i32
    %7 = arith.muli %arg1, %c256_i32 : i32
    %8 = tpu.iota {dimensions = array<i32: 1>} : vector<1x256xi32>
    %9 = vector.broadcast %7 : i32 to vector<1x256xi32>
    %10 = arith.addi %9, %8 : vector<1x256xi32>
    %c-1_i32 = arith.constant -1 : i32
    %11 = vector.broadcast %c-1_i32 : i32 to vector<1x256xi32>
    %12 = arith.cmpi ne, %6, %11 : vector<1x256xi32>
    %c256_i32_6 = arith.constant 256 : i32
    %13 = vector.broadcast %c256_i32_6 : i32 to vector<1x256xi32>
    %14 = arith.cmpi slt, %10, %13 : vector<1x256xi32>
    %15 = arith.andi %12, %14 : vector<1x256xi1>
    %cst = arith.constant dense<0xFF800000> : vector<256xf32>
    %16 = vector.multi_reduction <maximumf>, %4, %cst [0] : vector<4x256xf32> to vector<256xf32>
    %17 = vector.shape_cast %16 : vector<256xf32> to vector<1x256xf32>
    %18 = vector.broadcast %17 : vector<1x256xf32> to vector<4x256xf32>
    %19 = arith.subf %4, %18 : vector<4x256xf32>
    %20 = math.exp %19 : vector<4x256xf32>
    %cst_7 = arith.constant dense<0.000000e+00> : vector<256xf32>
    %21 = vector.multi_reduction <add>, %20, %cst_7 [0] : vector<4x256xf32> to vector<256xf32>
    %22 = vector.shape_cast %21 : vector<256xf32> to vector<1x256xf32>
    %23 = math.log %22 : vector<1x256xf32>
    %24 = arith.addf %17, %23 : vector<1x256xf32>
    %25 = tpu.iota {dimensions = array<i32: 0>} : vector<4x256xi32>
    %c0_i32_8 = arith.constant 0 : i32
    %26 = vector.broadcast %c0_i32_8 : i32 to vector<1x256xi32>
    %27 = arith.select %15, %6, %26 : vector<1x256xi1>, vector<1x256xi32>
    %28 = vector.broadcast %27 : vector<1x256xi32> to vector<4x256xi32>
    %29 = arith.cmpi eq, %25, %28 : vector<4x256xi32>
    %cst_9 = arith.constant 0.000000e+00 : f32
    %30 = vector.broadcast %cst_9 : f32 to vector<4x256xf32>
    %31 = arith.select %29, %4, %30 : vector<4x256xi1>, vector<4x256xf32>
    %cst_10 = arith.constant dense<0.000000e+00> : vector<256xf32>
    %32 = vector.multi_reduction <add>, %31, %cst_10 [0] : vector<4x256xf32> to vector<256xf32>
    %33 = vector.shape_cast %32 : vector<256xf32> to vector<1x256xf32>
    %34 = arith.subf %24, %33 : vector<1x256xf32>
    %cst_11 = arith.constant 0.000000e+00 : f32
    %35 = vector.broadcast %cst_11 : f32 to vector<1x256xf32>
    %36 = arith.select %15, %34, %35 : vector<1x256xi1>, vector<1x256xf32>
    %c0_12 = arith.constant 0 : index
    %c0_13 = arith.constant 0 : index
    %c0_14 = arith.constant 0 : index
    %37 = vector.load %arg4[%c0_12, %c0_13, %c0_14] : memref<1x1x256xf32, #tpu.memory_space<vmem>>, vector<1x1x256xf32>
    %38 = vector.shape_cast %36 : vector<1x256xf32> to vector<1x1x256xf32>
    %39 = arith.addf %37, %38 : vector<1x1x256xf32>
    %c0_15 = arith.constant 0 : index
    %c0_16 = arith.constant 0 : index
    %c0_17 = arith.constant 0 : index
    %40 = vector.load %arg4[%c0_15, %c0_16, %c0_17] : memref<1x1x256xf32, #tpu.memory_space<vmem>>, vector<1x1x256xf32>
    tpu.vector_store %arg4[%c0_15, %c0_16, %c0_17], %39 {strides = array<i32>} : memref<1x1x256xf32, #tpu.memory_space<vmem>>, vector<1x1x256xf32>,
    return
  }
  func.func @transform_0(%arg0: i32, %arg1: i32) -> (i32, i32, i32) {
    %c0_i32 = arith.constant 0 : i32
    %c0_i32_0 = arith.constant 0 : i32
    return %arg0, %c0_i32, %arg1 : i32, i32, i32
  }
  func.func @transform_1(%arg0: i32, %arg1: i32) -> (i32, i32, i32) {
    %c0_i32 = arith.constant 0 : i32
    %c0_i32_0 = arith.constant 0 : i32
    return %arg0, %c0_i32, %arg1 : i32, i32, i32
  }
  func.func @transform_2(%arg0: i32, %arg1: i32) -> (i32, i32, i32) {
    %c0_i32 = arith.constant 0 : i32
    %c0_i32_0 = arith.constant 0 : i32
    %c0_i32_1 = arith.constant 0 : i32
    return %arg0, %c0_i32, %c0_i32_0 : i32, i32, i32
  }
}

</mosaic_0001>

<bundles_post_ra>
// kernel: tpu_custom_call.1
= control target key start
LH: loop header
LB: loop body
LE: loop exit
PB: predicated region body
PF: predicated region fallthrough
CT: control target
= control target key end

     0   :  { %7 = vsyncpa [#allocation3], 0  ;;  %s1007_s0 = inlined_call_operand.hbm [shape: f32[2,4,256], index: 0, kind: input, shape index: {}]   ;;  %s1008_s1 = inlined_call_operand.hbm [shape: s32[2,1,256], index: 1, kind: input, shape index: {}]   ;;  %s1009_s2 = inlined_call_operand.hbm [shape: f32[2,1,256], index: 2, kind: output, shape index: {}]  }
   0x1   :  { %9 = vsyncpa [#allocation3 + $0x1], 0 }
   0x2   :  { %10 = vsyncpa [#allocation6], 0 }
   0x3   :  { %12 = vsyncpa [#allocation6 + $0x1], 0 }
   0x4   :  { %13 = vsyncpa [#allocation4], 0 }
   0x5   :  { %15 = vsyncpa [#allocation4 + $0x1], 0  ;;  %s755_s9 = smov 0   ;;  %s757_s10 = smov 0  }
   0x6   :  { %s759_s11 = smov 0   ;;  %s761_s12 = smov 0  }
   0x7   :  { %s763_s13 = smov 0   ;;  %s765_s14 = smov 0  }
   0x8 LB: > { %s487_s15 = sadd.s32 4294967295, %s732_s14   ;;  %s488_s16 = sadd.s32 4294967294, %s732_s14   ;;  %s732_s14 = sphi %s765_s14, %s21_s14   ;;  %s728_s13 = sphi %s763_s13, %s1033_s13   ;;  %s724_s12 = sphi %s761_s12, %s1032_s12   ;;  %s720_s11 = sphi %s759_s11, %s1031_s11   ;;  %s716_s10 = sphi %s757_s10, %s1030_s10   ;;  %s712_s9 = sphi %s755_s9, %s1029_s9  }
   0x9   : > { %s33_s17 = sadd.s32 1, %s728_s13  ;;  %s42_s18 = sadd.s32 1, %s720_s11 }
   0xa   : > { %p35_p0 = scmp.ge.s32.totalorder %s33_s17, 2  ;;  %p49_p1 = scmp.ne.s32.totalorder %s720_s11, %s716_s10 }
   0xb   : > { %p50_p2 = scmp.eq.s32.totalorder %s732_s14, 0  ;;  %p55_p3 = scmp.ne.s32.totalorder %s716_s10, %s712_s9 }
   0xc   : > { %s1035_s17 = smov (%p35_p0, %s33_s17), 0  ;;  %p56_p5 = scmp.eq.s32.totalorder %s487_s15, 0 }
   0xd   : > { %p796_p4 = por %p50_p2, %p49_p1  ;;  %s37_s20 = ssub.s32 %s728_s13, %s1035_s17 }
   0xe   : > { %p107_p6 = scmp.eq.s32.totalorder %s487_s15, 1  ;;  %p40_p7 = scmp.eq.s32.totalorder %s37_s20, 0 }
   0xf   : > { %p802_p8 = por %p56_p5, %p55_p3  ;;  %p113_p10 = scmp.eq.s32.totalorder %s488_s16, 1 }
  0x10   : > { %p806_p9 = por %p107_p6, %p49_p1  ;;  %p526_p13 = scmp.lt.s32.totalorder %s732_s14, 2 }
  0x11   : > { %s1013_s21 = scalar_select %p802_p8, 1, 0 }
  0x12   : > { %s1014_s22 = scalar_select %p806_p9, 1, 0 }
  0x13   : > { %s811_s23 = scalar_select %p40_p7, %s720_s11, %s42_s18  }
  0x14   : > { %p813_p11 = por %p113_p10, %p55_p3  ;;  %s820_s25 = sand.u32 1, %s720_s11  }
  0x15   : > { %s491_s26 = sshll.u32 %s820_s25, 3  ;;  %s506_s27 = sshll.u32 %s728_s13, 7 }
  0x16   : > { %s1015_s24 = scalar_select %p813_p11, 1, 0 }
  0x17   : > { %s827_s30 = scalar_lea.hbm %s1007_s0, %s506_s27  ;;  %s137_s3 = scalar_lea.vmem [#allocation2], %s491_s26 }
  0x18   : > { %s147_s4 = sshll.u32 %s137_s3, 4  ;;  %p833_p0 = pnand %p526_p13, %p796_p4  ;;  %s829_s4 = int_to_ptr.vmem [resolvable:$true] %s147_s4 }
  0x19   : > { %s134_s6 = scalar_lea.sflag [#allocation3], %s820_s25  ;;  %s586_s7 = scalar_lea.hbm %s827_s30, 128 }
  0x1a   : > { %p587_p3 = scmp.ne.s32.totalorder %s827_s30, %s586_s7  ;;  %p588_p5 = pneg %p833_p0 }
  0x1b   : > { %s591_s16 = scalar_lea.hbm %s1007_s0, 256  ;;  %p592_p4 = scmp.lt.u32.totalorder %s827_s30, %s1007_s0 }
  0x1c   : > { %p589_p6 = pnand %p588_p5, %p587_p3  ;;  %p593_p10 = scmp.lt.u32.totalorder %s591_s16, %s586_s7 }
  0x1d   : > { %p595_p12 = scmp.lt.u32.totalorder %s586_s7, %s827_s30 }
  0x1e   : > { %p590_p7 = pneg %p589_p6  ;;  %p594_p13 = por %p593_p10, %p592_p4 }
  0x20   : > { %p596_p1 = por %p595_p12, %p594_p13 }
  0x22   : > { %p597_p2 = pnand %p596_p1, %p590_p7 }
  0x24   : > { %600 = shalt.err (!%p597_p2)
}
  0x25   : > { %s601_s20 = scalar_lea.vmem %s829_s4, 128  ;;  %s734_s26 = smov [#allocation2]  }
  0x26   : > { %p602_p3 = scmp.ne.s32.totalorder %s829_s4, %s601_s20  ;;  %s606_s27 = sshll.u32 %s734_s26, 4  ;;  %s607_s27 = int_to_ptr.vmem [resolvable:$false] %s606_s27 }
  0x27   : > { %s608_s28 = scalar_lea.vmem %s607_s27, 256  ;;  %p609_p9 = scmp.lt.s32.totalorder %s829_s4, %s607_s27 }
  0x28   : > { %p604_p6 = pnand %p602_p3, %p588_p5  ;;  %p610_p4 = scmp.lt.s32.totalorder %s608_s28, %s601_s20 }
  0x2a   : > { %p605_p11 = pneg %p604_p6  ;;  %p611_p10 = por %p610_p4, %p609_p9 }
  0x2c   : > { %p612_p12 = pnand %p611_p10, %p605_p11 }
  0x2e   : > { %615 = shalt.err (!%p612_p12)
}
  0x2f   : > { %518 = dma.hbm_to_vmem [thread:$0]  (!%p833_p0), %s827_s30, 128, %s829_s4, %s134_s6  }
  0x30   : > { %p1017_p1 = scmp.lt.s32.totalorder %s732_s14, 3  ;;  %p1018_p2 = scmp.ge.s32.totalorder %s732_s14, 1 }
  0x31   : > { %s494_s3 = sshll.u32 %s820_s25, 1  ;;  %s507_s7 = sshll.u32 %s728_s13, 5 }
  0x32   : > { %p869_p7 = pnand %p1018_p2, %p1017_p1  ;;  %s878_s16 = scalar_lea.hbm %s1008_s1, %s507_s7 }
  0x33   : > { %s158_s18 = scalar_lea.vmem [#allocation5], %s494_s3  ;;  %s155_s30 = scalar_lea.sflag [#allocation6], %s820_s25 }
  0x34   : > { %s1019_s29 = scalar_select %p869_p7, 1, 0 }
  0x35   : > { %s168_s19 = sshll.u32 %s158_s18, 4  ;;  %s616_s4 = scalar_lea.hbm %s878_s16, 32  ;;  %s169_s19 = int_to_ptr.vmem [resolvable:$true] %s168_s19 }
  0x36   : > { %p617_p9 = scmp.ne.s32.totalorder %s878_s16, %s616_s4  ;;  %s621_s26 = scalar_lea.hbm %s1008_s1, 64 }
  0x37   : > { %p622_p3 = scmp.lt.u32.totalorder %s878_s16, %s1008_s1  ;;  %p623_p6 = scmp.lt.u32.totalorder %s621_s26, %s616_s4 }
  0x38   : > { %p619_p11 = pnand %p617_p9, %p588_p5  ;;  %p625_p10 = scmp.lt.u32.totalorder %s616_s4, %s878_s16 }
  0x39   : > { %p624_p4 = por %p623_p6, %p622_p3 }
  0x3a   : > { %p620_p13 = pneg %p619_p11 }
  0x3b   : > { %p626_p12 = por %p625_p10, %p624_p4 }
  0x3d   : > { %p627_p1 = pnand %p626_p12, %p620_p13 }
  0x3f   : > { %630 = shalt.err (!%p627_p1)
}
  0x40   : > { %s631_s25 = scalar_lea.vmem %s169_s19, 32  ;;  %s735_s3 = smov [#allocation5]  }
  0x41   : > { %p632_p2 = scmp.ne.s32.totalorder %s169_s19, %s631_s25  ;;  %s636_s7 = sshll.u32 %s735_s3, 4  ;;  %s637_s7 = int_to_ptr.vmem [resolvable:$false] %s636_s7 }
  0x42   : > { %s638_s8 = scalar_lea.vmem %s637_s7, 64  ;;  %p639_p8 = scmp.lt.s32.totalorder %s169_s19, %s637_s7 }
  0x43   : > { %p634_p9 = pnand %p632_p2, %p588_p5  ;;  %p640_p7 = scmp.lt.s32.totalorder %s638_s8, %s631_s25 }
  0x45   : > { %p635_p11 = pneg %p634_p9  ;;  %p641_p3 = por %p640_p7, %p639_p8 }
  0x47   : > { %p642_p6 = pnand %p641_p3, %p635_p11 }
  0x49   : > { %645 = shalt.err (!%p642_p6)
}
  0x4a   : > { %521 = dma.hbm_to_vmem [thread:$0]  (!%p833_p0), %s878_s16, 32, %s169_s19, %s155_s30  }
  0x4b   : > { %p1020_p13 = scmp.ne.s32.totalorder %s1019_s29, 0 }
  0x4c   : > { %s903_s15 = sand.u32 (!%p1020_p13), 1, %s716_s10   ;;  %p1021_p5 = scmp.ne.s32.totalorder (!%p1020_p13), %s1013_s21, 0 }
  0x4d   : > { %177 = sbr.rel (%p1020_p13) target bundleno = 177 (0xb1), region = 28  ;;  %s498_s18 = sshll.u32 (!%p1020_p13), %s903_s15, 3 }
  0x4e   : > { %s180_s4 = scalar_lea.sflag (!%p1020_p13), [#allocation3], %s903_s15  ;;  %s183_s6 = scalar_lea.vmem (!%p1020_p13), [#allocation2], %s498_s18 }
  0x54   : > { %699 = dma.done.wait (%p1021_p5), %s180_s4, 128  }
  0x55   : > { %701 = vsyncadd (%p1021_p5), %s180_s4, 4294967168  ;;  %s499_s5 = sshll.u32 %s903_s15, 1  ;;  %s189_s29 = scalar_lea.sflag [#allocation6], %s903_s15 }
  0x56   : > { %s913_s16 = scalar_lea.vmem [#allocation5], %s499_s5 }
  0x57   : > { %703 = dma.done.wait (%p1021_p5), %s189_s29, 32  }
  0x58   : > { %705 = vsyncadd (%p1021_p5), %s189_s29, 4294967264  ;;  %v224_v0 = vlaneseq  ;;  %v736_v2 = vmov 1966171168   ;;  %s923_s19 = scalar_lea.vmem [#allocation7], %s499_s5  ;;  %v737_v4 = vmov 0.0   ;;  %vm263_vm1 = vcmask 1043456  }
  0x59   : > { %v245_v3 = vunpack.c.l.s4 %v736_v2  ;;  %v229_v7 = vld [vmem:[%s183_s6] sm:$0xff]  ;;  %v738_v11 = vmov 1   ;;  %v230_v25 = vld [vmem:[%s913_s16] sm:$0x3]  ;;  %s508_s21 = sshll.u32 %s724_s12, 5  ;;  %s380_s30 = sshll.u32 %s923_s19, 4  ;;  %s957_s30 = int_to_ptr.vmem [resolvable:$true] %s380_s30 }
  0x5a   : > { %vm919_vm0 = vcmp.lt.s32.totalorder %v224_v0, 256  ;;  %v248_v6 = vshrl.u32 %v224_v0, 7  ;;  %v261_v8 = vcombine.high %v229_v7, %v229_v7  ;;  %v264_v9 = vsel %vm263_vm1, %v229_v7, -inf  ;;  %s955_s27 = scalar_lea.hbm %s1009_s2, %s508_s21  ;;  %s366_s28 = scalar_lea.sflag [#allocation4], %s903_s15 }
  0x5b   : > { %228 = vst.msk [vmem:[%s923_s19] sm:$0x3] %vm919_vm0, %v737_v4  ;;  %v246_v5 = vunpack.c.0.s8 %v245_v3  ;;  %v265_v10 = vrot.slane %v264_v9, 4  ;;  %v243_v12 = vcombine.low %v738_v11, %v738_v11  ;;  %vm238_vm2 = vcmp.ne.s32.totalorder %v230_v25, 4294967295  ;;  %s646_s12 = scalar_lea.vmem %s957_s30, 32  ;;  %p1026_p0 = scmp.ne.s32.totalorder %s1014_s22, 0 }
  0x5c   : > { %v271_v14 = vsel %vm263_vm1, %v261_v8, -inf  ;;  %v313_v33 = vsub.s32 0, %v248_v6  ;;  %v317_v35 = vsub.s32 1, %v248_v6  ;;  %p647_p8 = scmp.ne.s32.totalorder %s957_s30, %s646_s12  ;;  %s739_s25 = smov [#allocation7]  }
  0x5d   : > { %v929_v13 = vsub.s32 %v246_v5, %v248_v6  ;;  %v266_v15 = vmax.f32 %v264_v9, %v265_v10  ;;  %v272_v16 = vrot.slane %v271_v14, 4  ;;  %s650_s3 = sshll.u32 %s739_s25, 4  ;;  %s651_s3 = int_to_ptr.vmem [resolvable:$false] %s650_s3 }
  0x5e   : > { %p648_p7 = pnand %p647_p8, %p1026_p0  ;;  %s652_s7 = scalar_lea.vmem %s651_s3, 64 }
  0x5f   : > { %v267_v17 = vrot.slane %v266_v15, 2  ;;  %v273_v18 = vmax.f32 %v271_v14, %v272_v16  ;;  %v250_v19 = vrot.slane %v243_v12, %v929_v13  ;;  %p653_p10 = scmp.lt.s32.totalorder %s957_s30, %s651_s3  ;;  %p654_p12 = scmp.lt.s32.totalorder %s652_s7, %s646_s12 }
  0x60   : > { %p649_p4 = pneg %p648_p7 }
  0x61   : > { %v268_v20 = vmax.f32 %v266_v15, %v267_v17  ;;  %v274_v21 = vrot.slane %v273_v18, 2  ;;  %v257_v24 = vrot.slane %v250_v19, %v929_v13  ;;  %p655_p1 = por %p654_p12, %p653_p10 }
  0x62   : > { %v358_v19 = vld [vmem:[%s923_s19] sm:$0x3] }
  0x63   : > { %v269_v22 = vrot.slane %v268_v20, 1  ;;  %v275_v23 = vmax.f32 %v273_v18, %v274_v21  ;;  %vm258_vm3 = vcmp.ne.s32.totalorder %v257_v24, 0  ;;  %p656_p2 = pnand %p655_p1, %p649_p4 }
  0x64   : > { %vm935_vm4 = vmand %vm238_vm2, %vm258_vm3 }
  0x65   : > { %v270_v26 = vmax.f32 %v268_v20, %v269_v22  ;;  %v276_v27 = vrot.slane %v275_v23, 1  ;;  %v310_v34 = vsel %vm935_vm4, %v230_v25, 0 }
  0x66   : > { %v314_v36 = vrot.slane %v310_v34, %v313_v33  ;;  %v318_v37 = vrot.slane %v310_v34, %v317_v35 }
  0x67   : > { %v277_v28 = vmax.f32 %v275_v23, %v276_v27 }
  0x68   : > { %vm319_vm5 = vcmp.eq.s32.totalorder %v248_v6, %v314_v36  ;;  %vm320_vm6 = vcmp.eq.s32.totalorder %v248_v6, %v318_v37 }
  0x69   : > { %v280_v29 = vcombine.low %v270_v26, %v277_v28  ;;  %v321_v38 = vsel %vm319_vm5, %v229_v7, 0.0  ;;  %v322_v42 = vsel %vm320_vm6, %v261_v8, 0.0 }
  0x6a   : > { %v323_v44 = vsel %vm263_vm1, %v321_v38, 0.0  ;;  %v330_v48 = vsel %vm263_vm1, %v322_v42, 0.0 }
  0x6b   : > { %v282_v31 = vsub.f32 %v229_v7, %v280_v29  ;;  %v324_v49 = vrot.slane %v323_v44, 4  ;;  %v331_v52 = vrot.slane %v330_v48, 4 }
  0x6d   : > { %v283_v32 = vmul.f32 1.442695, %v282_v31  ;;  %v325_v55 = vadd.f32 %v324_v49, %v323_v44  ;;  %v332_v58 = vadd.f32 %v331_v52, %v330_v48 }
  0x6f   : > { %580 = vpow2.f32 %v283_v32  ;;  %v326_v61 = vrot.slane %v325_v55, 2  ;;  %v333_v63 = vrot.slane %v332_v58, 2 }
  0x71   : > { %v327_v0 = vadd.f32 %v326_v61, %v325_v55  ;;  %v334_v2 = vadd.f32 %v333_v63, %v332_v58 }
  0x73   : > { %v328_v3 = vrot.slane %v327_v0, 1  ;;  %v335_v4 = vrot.slane %v334_v2, 1 }
  0x75   : > { %v329_v7 = vadd.f32 %v328_v3, %v327_v0  ;;  %v336_v11 = vadd.f32 %v335_v4, %v334_v2 }
  0x79   : > { %v581_v39 = vpop.eup %580 }
  0x7a   : > { %v286_v40 = vcombine.high %v581_v39, %v581_v39  ;;  %v288_v41 = vsel %vm263_vm1, %v581_v39, 0.0 }
  0x7b   : > { %v289_v43 = vrot.slane %v288_v41, 4 }
  0x7c   : > { %v295_v45 = vsel %vm263_vm1, %v286_v40, 0.0 }
  0x7d   : > { %v290_v46 = vadd.f32 %v289_v43, %v288_v41  ;;  %v296_v47 = vrot.slane %v295_v45, 4 }
  0x7f   : > { %v291_v50 = vrot.slane %v290_v46, 2  ;;  %v297_v51 = vadd.f32 %v296_v47, %v295_v45 }
  0x81   : > { %v292_v53 = vadd.f32 %v291_v50, %v290_v46  ;;  %v298_v54 = vrot.slane %v297_v51, 2 }
  0x83   : > { %v293_v56 = vrot.slane %v292_v53, 1  ;;  %v299_v57 = vadd.f32 %v298_v54, %v297_v51 }
  0x85   : > { %v294_v59 = vadd.f32 %v293_v56, %v292_v53  ;;  %v300_v60 = vrot.slane %v299_v57, 1 }
  0x87   : > { %v301_v62 = vadd.f32 %v300_v60, %v299_v57  ;;  %582 = vlog2.f32 %v294_v59 }
  0x89   : > { %584 = vlog2.f32 %v301_v62 }
  0x91   : > { %v583_v5 = vpop.eup %582 }
  0x92   : > { %v303_v6 = vmul.f32 0.6931472, %v583_v5 }
  0x93   : > { %v585_v8 = vpop.eup %584 }
  0x94   : > { %v305_v9 = vmul.f32 0.6931472, %v585_v8  ;;  %v306_v10 = vadd.f32 %v303_v6, %v270_v26 }
  0x96   : > { %v307_v12 = vadd.f32 %v305_v9, %v277_v28  ;;  %v337_v14 = vsub.f32 %v306_v10, %v329_v7 }
  0x98   : > { %v338_v15 = vsub.f32 %v307_v12, %v336_v11 }
  0x9a   : > { %v341_v16 = vcombine.low %v337_v14, %v338_v15 }
  0x9c   : > { %v348_v17 = vrot.slane %v341_v16, %v929_v13 }
  0x9e   : > { %v355_v18 = vrot.slane %v348_v17, %v929_v13 }
  0xa0   : > { %v357_v20 = vsel %vm935_vm4, %v355_v18, 0.0 }
  0xa1   : > { %v359_v21 = vadd.f32 %v358_v19, %v357_v20 }
  0xa3   : > { %364 = vst.msk [vmem:[%s923_s19] sm:$0x3] %vm919_vm0, %v359_v21 }
  0xa4   : > { %659 = shalt.err (!%p656_p2)
}
  0xa5   : > { %s660_s8 = scalar_lea.hbm %s955_s27, 32  ;;  %s664_s4 = scalar_lea.hbm %s1009_s2, 64 }
  0xa6   : > { %p661_p9 = scmp.ne.s32.totalorder %s955_s27, %s660_s8  ;;  %p665_p6 = scmp.lt.u32.totalorder %s955_s27, %s1009_s2 }
  0xa7   : > { %p666_p13 = scmp.lt.u32.totalorder %s664_s4, %s660_s8  ;;  %p668_p8 = scmp.lt.u32.totalorder %s660_s8, %s955_s27 }
  0xa8   : > { %p662_p11 = pnand %p661_p9, %p1026_p0 }
  0xa9   : > { %p667_p5 = por %p666_p13, %p665_p6 }
  0xaa   : > { %p663_p3 = pneg %p662_p11 }
  0xab   : > { %p669_p7 = por %p668_p8, %p667_p5 }
  0xad   : > { %p670_p4 = pnand %p669_p7, %p663_p3 }
  0xaf   : > { %673 = shalt.err (!%p670_p4)
}
  0xb0   : > { %513 = dma.vmem_to_hbm [thread:$0]  (%p1026_p0), %s957_s30, 32, %s955_s27, %s366_s28  }
  0xb1 PF: > { %s392_s29 = sand.u32 1, %s712_s9   ;;  %p1027_p10 = scmp.ne.s32.totalorder %s1015_s24, 0 }
  0xb2   : > { %p1028_p12 = scmp.ge.s32.totalorder %s732_s14, 2  ;;  %s393_s16 = scalar_lea.sflag [#allocation4], %s392_s29 }
  0xb4   : > { %p523_p1 = pnand %p1028_p12, %p1027_p10 }
  0xb6   : > { %707 = dma.done.wait (!%p523_p1), %s393_s16, 32  }
  0xb7   : > { %709 = vsyncadd (!%p523_p1), %s393_s16, 4294967264  ;;  %s21_s14 = sadd.s32 1, %s732_s14   ;;  %s1029_s9 = smov %s716_s10 }
  0xb8   : > { %p18_p2 = scmp.ge.s32.totalorder %s21_s14, 4   ;;  %s1030_s10 = smov %s720_s11 }
  0xb9   : > { %s1031_s11 = smov %s811_s23  ;;  %s1032_s12 = smov %s728_s13 }
  0xba   : > { %s1033_s13 = smov %s1035_s17  ;;  %20 = sbr.rel (!%p18_p2) target bundleno = 8 (0x8), region = 90 }
  0xc1   :  { %398 = vsyncpa [#allocation3], 1 }
  0xc2   :  { %400 = vsyncpa [#allocation3 + $0x1], 1 }
  0xc3   :  { %401 = vsyncpa [#allocation6], 1 }
  0xc4   :  { %403 = vsyncpa [#allocation6 + $0x1], 1 }
  0xc5   :  { %404 = vsyncpa [#allocation4], 1 }
  0xc6   :  { %406 = vsyncpa [#allocation4 + $0x1], 1 }

</bundles_post_ra>
